<compile_context>
chip_gen: v5e
topology: v5e:2x2
jax: 0.10.0
libtpu: 0.0.40
codegen_flags: <defaults>
</compile_context>

<pallas_src>
import functools

import jax
import jax.numpy as jnp
from jax.experimental import pallas as pl
from jax.experimental.pallas import tpu as pltpu


# ----------------------------------------------------------------------------
# Helpers
# ----------------------------------------------------------------------------
def _round_up(x, m):
    return (x + m - 1) // m * m


def _pick_big_tile():
    """256 on v6e/v7x (2x256^2 MXU), 128 on v5e (4x128^2 MXU)."""
    try:
        kind = jax.devices()[0].device_kind.lower()
        if "v5 lite" in kind or "v5e" in kind or "v5lite" in kind:
            return 128
    except Exception:
        pass
    return 256


_BIG_TILE = _pick_big_tile()


# ----------------------------------------------------------------------------
# Pallas kernels
# ----------------------------------------------------------------------------
def _matmul_kernel(a_ref, b_ref, bias_ref, o_ref, acc_ref, *, relu):
    """bf16 x bf16 -> f32 accumulate; bias + optional ReLU fused in epilogue."""
    @pl.when(pl.program_id(2) == 0)
    def _():
        acc_ref[...] = jnp.zeros_like(acc_ref)

    acc_ref[...] += jnp.dot(a_ref[...], b_ref[...],
                            preferred_element_type=jnp.float32)

    @pl.when(pl.program_id(2) == pl.num_programs(2) - 1)
    def _():
        r = acc_ref[...] + bias_ref[...]          # (tm,tn) + (1,tn) broadcast
        if relu:
            r = jnp.maximum(r, 0.0)
        o_ref[...] = r.astype(o_ref.dtype)


def _scale_kernel(x_ref, y_ref, o_ref):
    # (1, M, C) * (1, 1, C) -> (1, M, C)  channel attention scaling
    o_ref[...] = x_ref[...] * y_ref[...]


def _pick_tiles(M, Kp, Np):
    """Layer-adaptive tiles.  Kp, Np are already multiples of 128."""
    big = _BIG_TILE
    m8 = _round_up(max(M, 1), 8)
    if m8 >= big:
        tm, Mp = big, _round_up(M, big)
    else:
        tm, Mp = m8, m8
    tn = big if (Np >= big and Np % big == 0) else 128
    if Kp <= 1024:
        tk = Kp                                   # single K step
    else:
        tk = 128
        for cand in range(1024, 0, -128):
            if Kp % cand == 0:
                tk = cand
                break
    return tm, tn, tk, Mp


def pallas_matmul_prepped(a, p, relu=False):
    """a: (M, K_logical) activation.  p: prepared weight dict
    {"w": (Kp, Np) bf16, "b": (1, Np) f32, "k": K, "n": N}.  Returns (M, N) f32."""
    w, bias = p["w"], p["b"]
    M, K = a.shape
    Kp, Np = w.shape
    assert K == p["k"]
    tm, tn, tk, Mp = _pick_tiles(M, Kp, Np)

    a_p = a.astype(jnp.bfloat16)
    if Mp != M or Kp != K:
        a_p = jnp.pad(a_p, ((0, Mp - M), (0, Kp - K)))

    out = pl.pallas_call(
        functools.partial(_matmul_kernel, relu=relu),
        out_shape=jax.ShapeDtypeStruct((Mp, Np), jnp.float32),
        grid_spec=pltpu.PrefetchScalarGridSpec(
            num_scalar_prefetch=0,
            grid=(Mp // tm, Np // tn, Kp // tk),
            in_specs=[pl.BlockSpec((tm, tk), lambda i, j, k: (i, k)),
                      pl.BlockSpec((tk, tn), lambda i, j, k: (k, j)),
                      pl.BlockSpec((1, tn), lambda i, j, k: (0, j))],
            out_specs=pl.BlockSpec((tm, tn), lambda i, j, k: (i, j)),
            scratch_shapes=[pltpu.VMEM((tm, tn), jnp.float32)]),
        compiler_params=pltpu.CompilerParams(
            dimension_semantics=("parallel", "parallel", "arbitrary")),
    )(a_p, w, bias)
    return out[:M, :p["n"]]


def apply_channel_scale(x_nhwc, y):
    """out[b,h,w,c] = x[b,h,w,c] * y[b,c]  -- single batched Pallas call."""
    N, H, W, C = x_nhwc.shape
    M = H * W
    x2 = x_nhwc.reshape(N, M, C)
    y2 = y.reshape(N, 1, C).astype(jnp.float32)
    out = pl.pallas_call(
        _scale_kernel,
        out_shape=jax.ShapeDtypeStruct((N, M, C), jnp.float32),
        grid=(N,),
        in_specs=[pl.BlockSpec((1, M, C), lambda b: (b, 0, 0)),
                  pl.BlockSpec((1, 1, C), lambda b: (b, 0, 0))],
        out_specs=pl.BlockSpec((1, M, C), lambda b: (b, 0, 0)),
    )(x2, y2)
    return out.reshape(N, H, W, C)


# ----------------------------------------------------------------------------
# Layers (glue in plain JAX; all heavy matmuls go through the Pallas kernel)
# ----------------------------------------------------------------------------
def conv2d_nhwc(x, p, relu=False):
    """1x1 (stride 1) or 3x3 (stride 1, pad 1) conv via Pallas matmul.
    p is a prepared weight dict (see _prep_matmul_weight)."""
    N, H, W, C = x.shape
    kh = p["ksize"]
    xb = x.astype(jnp.bfloat16)                  # halve im2col / DMA bytes
    if kh == 1:
        a = xb.reshape(N * H * W, C)
    else:  # 3x3, pad=1
        # TODO(synk): im2col is still materialized host-side in bf16; fully
        # in-kernel 9-tap gather (pl.Element offset indexing) left as future work.
        xp = jnp.pad(xb, ((0, 0), (1, 1), (1, 1), (0, 0)))
        cols = [xp[:, dh:dh + H, dw:dw + W, :]
                for dh in range(3) for dw in range(3)]
        a = jnp.concatenate(cols, axis=-1).reshape(N * H * W, 9 * C)
    y = pallas_matmul_prepped(a, p, relu=relu)
    return y.reshape(N, H, W, p["n"])


def maxpool2(x):
    N, H, W, C = x.shape
    return x.reshape(N, H // 2, 2, W // 2, 2, C).max(axis=(2, 4))


def adaptive_avg_pool(x, S):
    """Matches torch AdaptiveAvgPool2d(S) (handles output > input too)."""
    N, H, W, C = x.shape
    rows = []
    for i in range(S):
        h0, h1 = (i * H) // S, -(-((i + 1) * H) // S)
        cols = []
        for j in range(S):
            w0, w1 = (j * W) // S, -(-((j + 1) * W) // S)
            cols.append(x[:, h0:h1, w0:w1, :].mean(axis=(1, 2)))
        rows.append(jnp.stack(cols, axis=1))
    return jnp.stack(rows, axis=1)  # (N, S, S, C)


def bilinear_resize(x, oh, ow):
    """Bilinear, align_corners=True (matches the module's interpolate/Upsample)."""
    N, H, W, C = x.shape

    def coords(out, inn):
        if out == 1:
            z = jnp.zeros((1,), jnp.float32)
            return z, jnp.zeros((1,), jnp.int32), jnp.zeros((1,), jnp.int32)
        src = jnp.arange(out, dtype=jnp.float32) * ((inn - 1) / (out - 1))
        i0 = jnp.clip(jnp.floor(src).astype(jnp.int32), 0, inn - 1)
        i1 = jnp.clip(i0 + 1, 0, inn - 1)
        return src - i0.astype(jnp.float32), i0, i1

    fh, h0, h1 = coords(oh, H)
    fw, w0, w1 = coords(ow, W)
    top, bot = x[:, h0, :, :], x[:, h1, :, :]
    xh = top * (1 - fh)[None, :, None, None] + bot * fh[None, :, None, None]
    lf, rt = xh[:, :, w0, :], xh[:, :, w1, :]
    return lf * (1 - fw)[None, None, :, None] + rt * fw[None, None, :, None]


# ----------------------------------------------------------------------------
# Model blocks
# ----------------------------------------------------------------------------
def famca(p, left, down, right):
    _, Hl, Wl, _ = left.shape
    down = bilinear_resize(down, Hl, Wl)
    down = conv2d_nhwc(down, p["conv"], relu=True)
    merge = jnp.concatenate([left, down, right], axis=-1)
    merge = conv2d_nhwc(merge, p["cat"], relu=True)
    y = merge.mean(axis=(1, 2))                  # AdaptiveAvgPool2d(1)
    y = jnp.maximum(y @ p["fc1"].T, 0.0)         # tiny M (=batch) -> plain XLA
    y = jax.nn.sigmoid(y @ p["fc2"].T)
    return apply_channel_scale(merge, y)


def famca_single(p, x):
    _, H, W, _ = x.shape
    x = bilinear_resize(x, 2 * H, 2 * W)
    x = conv2d_nhwc(x, p["conv"], relu=True)
    y = x.mean(axis=(1, 2))
    y = jnp.maximum(y @ p["fc1"].T, 0.0)
    y = jax.nn.sigmoid(y @ p["fc2"].T)
    return apply_channel_scale(x, y)


def lspm_layer(p, x, S):
    # All bmm's here are tiny (H*W of x5 is only a few elements) -> plain XLA
    # per perf review; the 1x1 convs still go through the Pallas matmul kernel.
    N, H, W, C = x.shape
    HW = H * W
    xf = x.reshape(N, HW, C)                                  # == torch x_reshape_T
    mm1 = jax.nn.softmax(jnp.einsum('bmc,bnc->bmn', xf, xf), axis=-1)
    x_conv = conv2d_nhwc(x, p["conv"])                        # (N,H,W,S*S)
    x_conv = jnp.transpose(x_conv.reshape(N, HW, S * S), (0, 2, 1))
    mm2 = jnp.einsum('bsm,bmn->bsn', x_conv, mm1)             # (N, S*S, HW)
    gap = adaptive_avg_pool(x, S)
    gap = conv2d_nhwc(gap, p["gap"], relu=True)
    gap = jnp.transpose(gap.reshape(N, S * S, C), (0, 2, 1))  # (N, C, S*S)
    mm3 = jnp.einsum('bcs,bsn->bcn', gap, mm2)                # (N, C, HW)
    mm3 = jnp.transpose(mm3, (0, 2, 1)).reshape(N, H, W, C)
    return mm3 + x


def lspm(p, x):
    l1 = lspm_layer(p["l1"], x, 1)
    l2 = lspm_layer(p["l2"], x, 2)
    l3 = lspm_layer(p["l3"], x, 3)
    l6 = lspm_layer(p["l6"], x, 6)
    out = jnp.concatenate([x, l1, l2, l3, l6], axis=-1)
    return conv2d_nhwc(out, p["conv"])


# TODO(synk): VGG class source not provided; assuming standard VGG16 block
# split (conv1=2x64, conv2=pool+2x128, conv3=pool+3x256, conv4=pool+3x512,
# conv5=pool+3x512), consistent with the channel counts model_VGG requires.
def vgg_block(x, convs, pool_first):
    if pool_first:
        x = maxpool2(x)
    for p in convs:
        x = conv2d_nhwc(x, p, relu=True)
    return x


def model_forward(params, x_nchw):
    x = jnp.transpose(x_nchw, (0, 2, 3, 1)).astype(jnp.float32)
    x1 = vgg_block(x, params["vgg"][0], pool_first=False)
    x2 = vgg_block(x1, params["vgg"][1], pool_first=True)
    x3 = vgg_block(x2, params["vgg"][2], pool_first=True)
    x4 = vgg_block(x3, params["vgg"][3], pool_first=True)
    x5 = vgg_block(x4, params["vgg"][4], pool_first=True)

    lspm_out = lspm(params["lspm"], x5)
    H5 = x5.shape[1]
    GG = []
    for i, s in enumerate((2, 4, 8)):
        up = bilinear_resize(lspm_out, H5 * s, H5 * s)
        GG.append(conv2d_nhwc(up, params["infos"][i], relu=True))

    merge = famca(params["agg4"], x4, x5, GG[0])
    merge = famca(params["agg3"], x3, merge, GG[1])
    merge = famca(params["agg2"], x2, merge, GG[2])
    merge = famca_single(params["agg1"], merge)
    merge = conv2d_nhwc(merge, params["score"])
    out = bilinear_resize(merge, x1.shape[1], x1.shape[2])
    return jnp.transpose(out, (0, 3, 1, 2))                   # back to NCHW


# ----------------------------------------------------------------------------
# Deterministic parameter construction (weights prepared for the kernel:
# pre-transposed to (K, N), pre-padded to 128-multiples, pre-cast to bf16).
# ----------------------------------------------------------------------------
def _prep_matmul_weight(w_kn, bias=None):
    K, N = w_kn.shape
    Kp, Np = _round_up(K, 128), _round_up(N, 128)
    wp = jnp.pad(w_kn, ((0, Kp - K), (0, Np - N))).astype(jnp.bfloat16)
    if bias is None:
        bp = jnp.zeros((1, Np), jnp.float32)
    else:
        bp = jnp.pad(bias.reshape(1, N).astype(jnp.float32),
                     ((0, 0), (0, Np - N)))
    return {"w": wp, "b": bp, "k": K, "n": N}


def build_params():
    keys = iter(jax.random.split(jax.random.PRNGKey(0), 128))

    def nk():
        return next(keys)

    def conv_p(o, i, k, bias=False):
        std = (2.0 / (i * k * k)) ** 0.5
        w = jax.random.normal(nk(), (o, i, k, k), jnp.float32) * std
        if k == 1:
            wkn = w.reshape(o, i).T
        else:  # matches im2col column order (dh, dw, c)
            wkn = jnp.transpose(w, (2, 3, 1, 0)).reshape(k * k * i, o)
        b = jnp.zeros((o,), jnp.float32) if bias else None
        p = _prep_matmul_weight(wkn, b)
        p["ksize"] = k
        return p

    def lin_w(o, i):
        return jax.random.normal(nk(), (o, i), jnp.float32) * (2.0 / i) ** 0.5

    vgg_cfg = [[(3, 64), (64, 64)],
               [(64, 128), (128, 128)],
               [(128, 256), (256, 256), (256, 256)],
               [(256, 512), (512, 512), (512, 512)],
               [(512, 512), (512, 512), (512, 512)]]
    vgg_p = [[conv_p(o, i, 3, bias=True) for (i, o) in blk] for blk in vgg_cfg]

    def lspm_layer_p(c, s):
        return {"conv": conv_p(s * s, c, 1), "gap": conv_p(c, c, 1)}

    lspm_p = {"l1": lspm_layer_p(512, 1), "l2": lspm_layer_p(512, 2),
              "l3": lspm_layer_p(512, 3), "l6": lspm_layer_p(512, 6),
              "conv": conv_p(512, 5 * 512, 1)}

    def famca_p(cin, cout):
        return {"conv": conv_p(cout, cin, 1),
                "cat": conv_p(cout, 3 * cout, 3),
                "fc1": lin_w(cout // 4, cout),
                "fc2": lin_w(cout, cout // 4)}

    return {
        "vgg": vgg_p,
        "lspm": lspm_p,
        "infos": [conv_p(512, 512, 3), conv_p(256, 512, 3), conv_p(128, 512, 3)],
        "agg4": famca_p(512, 512),
        "agg3": famca_p(512, 256),
        "agg2": famca_p(256, 128),
        "agg1": {"conv": conv_p(128, 128, 1),
                 "fc1": lin_w(32, 128), "fc2": lin_w(128, 32)},
        "score": conv_p(1, 128, 1, bias=True),
    }


if __name__ == "__main__":
    params = build_params()
    x = jax.random.normal(jax.random.PRNGKey(0), (2, 3, 32, 32), jnp.float32)
    out = model_forward(params, x)
    out = jax.block_until_ready(out)
    assert out.shape == (2, 1, 32, 32), out.shape
    assert bool(jnp.all(jnp.isfinite(out)))
    print("KERNEL_OK")
</pallas_src>

<mosaic_0001>
module attributes {stable_mosaic.version = 11 : i64} {
  func.func @_matmul_kernel(%arg0: i32, %arg1: i32, %arg2: i32, %arg3: memref<256x128xbf16, #tpu.memory_space<vmem>>, %arg4: memref<128x128xbf16, #tpu.memory_space<vmem>>, %arg5: memref<1x128xf32, #tpu.memory_space<vmem>>, %arg6: memref<256x128xf32, #tpu.memory_space<vmem>>, %arg7: memref<256x128xf32, #tpu.memory_space<vmem>>) attributes {dimension_semantics = [#tpu.dimension_semantics<parallel>, #tpu.dimension_semantics<parallel>, #tpu.dimension_semantics<arbitrary>], iteration_bounds = array<i64: 8, 1, 1>, scalar_prefetch = 0 : i64, scratch_operands = 1 : i64, tpu.core_type = #tpu.core_type<tc>, window_params = [{transform_indices = @transform_0, window_bounds = array<i64: 256, 128>}, {transform_indices = @transform_1, window_bounds = array<i64: 128, 128>}, {transform_indices = @transform_2, window_bounds = array<i64: 1, 128>}, {transform_indices = @transform_3, window_bounds = array<i64: 256, 128>}]} {
    %c0_i32 = arith.constant 0 : i32
    %0 = arith.cmpi eq, %arg2, %c0_i32 : i32
    %1 = arith.extui %0 : i1 to i32
    %c0_i32_0 = arith.constant 0 : i32
    %2 = arith.cmpi ne, %1, %c0_i32_0 : i32
    scf.if %2 {
      %cst_10 = arith.constant 0.000000e+00 : f32
      %12 = vector.broadcast %cst_10 : f32 to vector<256x128xf32>
      %c0_11 = arith.constant 0 : index
      %c0_12 = arith.constant 0 : index
      %13 = vector.load %arg7[%c0_11, %c0_12] : memref<256x128xf32, #tpu.memory_space<vmem>>, vector<256x128xf32>
      tpu.vector_store %arg7[%c0_11, %c0_12], %12 {strides = array<i32>} : memref<256x128xf32, #tpu.memory_space<vmem>>, vector<256x128xf32>,
    } else {
    }
    %c0 = arith.constant 0 : index
    %c0_1 = arith.constant 0 : index
    %3 = vector.load %arg7[%c0, %c0_1] : memref<256x128xf32, #tpu.memory_space<vmem>>, vector<256x128xf32>
    %c0_2 = arith.constant 0 : index
    %c0_3 = arith.constant 0 : index
    %4 = vector.load %arg3[%c0_2, %c0_3] : memref<256x128xbf16, #tpu.memory_space<vmem>>, vector<256x128xbf16>
    %c0_4 = arith.constant 0 : index
    %c0_5 = arith.constant 0 : index
    %5 = vector.load %arg4[%c0_4, %c0_5] : memref<128x128xbf16, #tpu.memory_space<vmem>>, vector<128x128xbf16>
    %cst = arith.constant dense<0.000000e+00> : vector<256x128xf32>
    %6 = tpu.matmul %4, %5, %cst {dimension_numbers = #tpu.dot_dimension_numbers<[1], [0], [0], [1], [0, 0, 1, 1], [], []>} : vector<256x128xbf16>, vector<128x128xbf16>, vector<256x128xf32> -> vector<256x128xf32>
    %7 = arith.addf %3, %6 : vector<256x128xf32>
    %c0_6 = arith.constant 0 : index
    %c0_7 = arith.constant 0 : index
    %8 = vector.load %arg7[%c0_6, %c0_7] : memref<256x128xf32, #tpu.memory_space<vmem>>, vector<256x128xf32>
    tpu.vector_store %arg7[%c0_6, %c0_7], %7 {strides = array<i32>} : memref<256x128xf32, #tpu.memory_space<vmem>>, vector<256x128xf32>,
    %c0_i32_8 = arith.constant 0 : i32
    %9 = arith.cmpi eq, %arg2, %c0_i32_8 : i32
    %10 = arith.extui %9 : i1 to i32
    %c0_i32_9 = arith.constant 0 : i32
    %11 = arith.cmpi ne, %10, %c0_i32_9 : i32
    scf.if %11 {
      %c0_10 = arith.constant 0 : index
      %c0_11 = arith.constant 0 : index
      %12 = vector.load %arg7[%c0_10, %c0_11] : memref<256x128xf32, #tpu.memory_space<vmem>>, vector<256x128xf32>
      %c0_12 = arith.constant 0 : index
      %c0_13 = arith.constant 0 : index
      %13 = vector.load %arg5[%c0_12, %c0_13] : memref<1x128xf32, #tpu.memory_space<vmem>>, vector<1x128xf32>
      %14 = vector.broadcast %13 : vector<1x128xf32> to vector<256x128xf32>
      %15 = arith.addf %12, %14 : vector<256x128xf32>
      %cst_14 = arith.constant 0.000000e+00 : f32
      %16 = vector.broadcast %cst_14 : f32 to vector<256x128xf32>
      %17 = arith.maximumf %15, %16 : vector<256x128xf32>
      %c0_15 = arith.constant 0 : index
      %c0_16 = arith.constant 0 : index
      %18 = vector.load %arg6[%c0_15, %c0_16] : memref<256x128xf32, #tpu.memory_space<vmem>>, vector<256x128xf32>
      tpu.vector_store %arg6[%c0_15, %c0_16], %17 {strides = array<i32>} : memref<256x128xf32, #tpu.memory_space<vmem>>, vector<256x128xf32>,
    } else {
    }
    return
  }
  func.func @transform_0(%arg0: i32, %arg1: i32, %arg2: i32) -> (i32, i32) {
    %c0_i32 = arith.constant 0 : i32
    return %arg0, %arg2 : i32, i32
  }
  func.func @transform_1(%arg0: i32, %arg1: i32, %arg2: i32) -> (i32, i32) {
    %c0_i32 = arith.constant 0 : i32
    return %arg2, %arg1 : i32, i32
  }
  func.func @transform_2(%arg0: i32, %arg1: i32, %arg2: i32) -> (i32, i32) {
    %c0_i32 = arith.constant 0 : i32
    %c0_i32_0 = arith.constant 0 : i32
    return %c0_i32, %arg1 : i32, i32
  }
  func.func @transform_3(%arg0: i32, %arg1: i32, %arg2: i32) -> (i32, i32) {
    %c0_i32 = arith.constant 0 : i32
    return %arg0, %arg1 : i32, i32
  }
}

</mosaic_0001>

<bundles_post_ra>
// kernel: tpu_custom_call.1
= control target key start
LH: loop header
LB: loop body
LE: loop exit
PB: predicated region body
PF: predicated region fallthrough
CT: control target
= control target key end

     0   :  { %s1598_s0 = inlined_call_operand.hbm [shape: bf16[2048,128], index: 0, kind: input, shape index: {}]   ;;  %s1599_s1 = inlined_call_operand.hbm [shape: bf16[128,128], index: 1, kind: input, shape index: {}]   ;;  %s1600_s2 = inlined_call_operand.vmem [shape: f32[1,128], index: 2, kind: input, shape index: {}]   ;;  %s1601_s3 = inlined_call_operand.hbm [shape: f32[2048,128], index: 3, kind: output, shape index: {}]  }
   0x1   :  { %1603 = sst [smem:[#allocation12_spill]] %s1599_s1 }
   0x2   :  { %8 = vsyncpa [#allocation4], 0 }
   0x3   :  { %10 = vsyncpa [#allocation4 + $0x1], 0 }
   0x4   :  { %11 = vsyncpa [#allocation7], 0 }
   0x5   :  { %12 = vsyncpa [#allocation5], 0 }
   0x6   :  { %14 = vsyncpa [#allocation5 + $0x1], 0  ;;  %s1354_s12 = smov 0   ;;  %s1356_s13 = smov 0  }
   0x7   :  { %s1358_s14 = smov 0   ;;  %s1360_s15 = smov 0  }
   0x8   :  { %s1362_s16 = smov 0   ;;  %s1364_s17 = smov 0  }
   0x9 LB: > { %s939_s18 = sadd.s32 4294967295, %s1327_s17   ;;  %s940_s19 = sadd.s32 4294967294, %s1327_s17   ;;  %s1327_s17 = sphi %s1364_s17, %s20_s17   ;;  %s1323_s16 = sphi %s1362_s16, %s1617_s16   ;;  %s1319_s15 = sphi %s1360_s15, %s1616_s15   ;;  %s1315_s14 = sphi %s1358_s14, %s1615_s14   ;;  %s1311_s13 = sphi %s1356_s13, %s1614_s13   ;;  %s1307_s12 = sphi %s1354_s12, %s1613_s12  }
   0xa   : > { %p61_p0 = scmp.ne.s32.totalorder %s1311_s13, %s1307_s12  ;;  %p1388_p1 = scmp.eq.s32.totalorder %s939_s18, 0 }
   0xb   : > { %p1392_p2 = scmp.eq.s32.totalorder %s939_s18, 7  ;;  %p147_p3 = scmp.eq.s32.totalorder %s940_s19, 7 }
   0xc   : > { %p1398_p4 = por %p1388_p1, %p61_p0  ;;  %p941_p5 = scmp.ge.s32.totalorder %s1327_s17, 1 }
   0xd   : > { %p1403_p6 = por %p147_p3, %p61_p0  ;;  %p154_p7 = scmp.lt.s32.totalorder %s1327_s17, 9 }
   0xe   : > { %s1608_s1 = sld [smem:[#allocation12_spill]]  ;;  %s1329_s28 = smov [#allocation6]  }
   0xf   : > { %p1411_p8 = pnand %p941_p5, %p154_p7  ;;  %s171_s29 = sshll.u32 %s1329_s28, 4  ;;  %s172_s29 = int_to_ptr.vmem [resolvable:$true] %s171_s29 }
  0x10   : > { %s1602_s30 = smov 64   ;;  %s1331_s4 = smov 4  }
  0x11   : > { %p1111_p9 = pneg %p1411_p8  ;;  %s39_s5 = sadd.s32 1, %s1323_s16 }
  0x12   : > { %p41_p11 = scmp.ge.s32.totalorder %s39_s5, 8  ;;  %s48_s6 = sadd.s32 1, %s1315_s14 }
  0x13   : > { %p1112_p10 = pnand %p1111_p9, %p1388_p1  ;;  %p55_p12 = scmp.ne.s32.totalorder %s1315_s14, %s1311_s13 }
  0x14   : > { %s169_s26 = sshll.u32 %s1608_s1, 4  ;;  %p56_p13 = scmp.eq.s32.totalorder %s1327_s17, 0  ;;  %s170_s26 = int_to_ptr.hbm [resolvable:$true] %s169_s26 }
  0x15   : > { %1114 = dma.hbm_to_vmem [thread:$0]  (!%p1112_p10), %s170_s26, 1024, %s172_s29, [#allocation7], %s1602_s30, %s1602_s30, %s1331_s4  }
  0x16   : > { %s1619_s5 = smov (%p41_p11, %s39_s5), 0  ;;  %p1429_p0 = por %p56_p13, %p55_p12 }
  0x17   : > { %p1435_p3 = por %p1392_p2, %p55_p12  ;;  %s43_s9 = ssub.s32 %s1323_s16, %s1619_s5 }
  0x18   : > { %p1124_p5 = scmp.lt.s32.totalorder %s1327_s17, 8  ;;  %p46_p7 = scmp.eq.s32.totalorder %s43_s9, 0 }
  0x19   : > { %s191_s10 = sand.u32 1, %s1315_s14   ;;  %s1053_s19 = sshll.u32 %s1323_s16, 7 }
  0x1a   : > { %s945_s11 = sshll.u32 %s191_s10, 7  ;;  %s201_s26 = scalar_lea.hbm %s1598_s0, %s1053_s19 }
  0x1b   : > { %s1444_s18 = scalar_select %p46_p7, %s1315_s14, %s48_s6  }
  0x1c   : > { %s195_s28 = scalar_lea.vmem [#allocation3], %s945_s11  ;;  %s202_s21 = sshll.u32 %s201_s26, 4  ;;  %s203_s21 = int_to_ptr.hbm [resolvable:$true] %s202_s21 }
  0x1d   : > { %s204_s29 = sshll.u32 %s195_s28, 4  ;;  %p1116_p2 = pnand %p1124_p5, %p1429_p0  ;;  %s205_s29 = int_to_ptr.vmem [resolvable:$true] %s204_s29 }
  0x1e   : > { %s192_s30 = scalar_lea.sflag [#allocation4], %s191_s10  ;;  %s1612_s1 = smov 64  }
  0x1f   : > { %1118 = dma.hbm_to_vmem [thread:$0]  (!%p1116_p2), %s203_s21, 2048, %s205_s29, %s192_s30, %s1612_s1, %s1612_s1, %s1331_s4  }
  0x20   : > { %216 = sbr.rel (%p1411_p8) target bundleno = 270 (0x10e), region = 32  ;;  %s1458_s6 = sand.u32 (!%p1411_p8), 1, %s1311_s13  }
  0x21   : > { %s949_s9 = sshll.u32 (!%p1411_p8), %s1458_s6, 7  ;;  %s219_s11 = scalar_lea.sflag (!%p1411_p8), [#allocation4], %s1458_s6 }
  0x22   : > { %s1462_s19 = scalar_lea.vmem (!%p1411_p8), [#allocation3], %s949_s9 }
  0x25   : > { %1294 = dma.done.wait (%p1398_p4), %s219_s11, 2048  }
  0x26   : > { %1296 = vsyncadd (%p1398_p4), %s219_s11, 4294965248 }
  0x27   : > { %1298 = dma.done.wait (%p1388_p1), [#allocation7], 1024  }
  0x28   : > { %1300 = vsyncadd (%p1388_p1), [#allocation7], 4294966272  ;;  %v1077_v0 = vld [vmem:[#allocation6 + $0x38] sm:$0xff]  ;;  %v1076_v1 = vld [vmem:[#allocation6 + $0x30] sm:$0xff]  ;;  %s951_s22 = sshll.u32 %s1458_s6, 8  ;;  %s1078_s30 = sshll.u32 %s1319_s15, 8 }
  0x29   : > { %520 = vmatpush.bf16.msra.mxu0 %v1077_v0  ;;  %1079 = vmatpush.bf16.msra.mxu1 %v1077_v0  ;;  %v1075_v2 = vld [vmem:[#allocation6 + $0x28] sm:$0xff]  ;;  %v1074_v3 = vld [vmem:[#allocation6 + $0x20] sm:$0xff]  ;;  %v1073_v4 = vld [vmem:[#allocation6 + $0x18] sm:$0xff]  ;;  %s1496_s27 = scalar_lea.vmem [#allocation8], %s951_s22  ;;  %s821_s10 = scalar_lea.hbm %s1601_s3, %s1078_s30 }
  0x2a   : > { %1080 = vmatpush.bf16.msra.mxu2 %v1077_v0  ;;  %1081 = vmatpush.bf16.msra.mxu3 %v1077_v0  ;;  %v1072_v5 = vld [vmem:[#allocation6 + $0x10] sm:$0xff]  ;;  %v1071_v6 = vld [vmem:[#allocation6 + $0x8] sm:$0xff]  ;;  %v1070_v7 = vld [vmem:[#allocation6] sm:$0xff]  ;;  %s822_s24 = sshll.u32 %s1496_s27, 4  ;;  %s824_s15 = sshll.u32 %s821_s10, 4  ;;  %s823_s24 = int_to_ptr.vmem [resolvable:$true] %s822_s24  ;;  %s825_s15 = int_to_ptr.hbm [resolvable:$true] %s824_s15 }
  0x2b   : > { %v1054_v8 = vld [vmem:[%s1462_s19] sm:$0xff]  ;;  %v1055_v12 = vld [vmem:[%s1462_s19 + $0x8] sm:$0xff]  ;;  %v1056_v16 = vld [vmem:[%s1462_s19 + $0x10] sm:$0xff]  ;;  %s809_s25 = scalar_lea.sflag [#allocation5], %s1458_s6  ;;  %s1255_s26 = sshra.s32 %s825_s15, 4  ;;  %s1256_s26 = int_to_ptr.hbm [resolvable:$true] %s1255_s26 }
  0x2c   : > { %v1058_v9 = vld [vmem:[%s1462_s19 + $0x20] sm:$0xff]  ;;  %v1059_v13 = vld [vmem:[%s1462_s19 + $0x28] sm:$0xff]  ;;  %v1060_v17 = vld [vmem:[%s1462_s19 + $0x30] sm:$0xff]  ;;  %s1257_s28 = scalar_lea.hbm %s1256_s26, 256  ;;  %s1261_s9 = scalar_lea.hbm %s1601_s3, 2048 }
  0x2d   : > { %521 = vmatpush.bf16.msra.mxu0 %v1076_v1  ;;  %1082 = vmatpush.bf16.msra.mxu1 %v1076_v1  ;;  %v1062_v10 = vld [vmem:[%s1462_s19 + $0x40] sm:$0xff]  ;;  %v1063_v14 = vld [vmem:[%s1462_s19 + $0x48] sm:$0xff]  ;;  %v1064_v18 = vld [vmem:[%s1462_s19 + $0x50] sm:$0xff]  ;;  %p1258_p1 = scmp.ne.s32.totalorder %s1256_s26, %s1257_s28  ;;  %p1262_p9 = scmp.lt.s32.totalorder %s1256_s26, %s1601_s3 }
  0x2e   : > { %1083 = vmatpush.bf16.msra.mxu2 %v1076_v1  ;;  %1084 = vmatpush.bf16.msra.mxu3 %v1076_v1  ;;  %v1066_v11 = vld [vmem:[%s1462_s19 + $0x60] sm:$0xff]  ;;  %v1067_v15 = vld [vmem:[%s1462_s19 + $0x68] sm:$0xff]  ;;  %v1068_v19 = vld [vmem:[%s1462_s19 + $0x70] sm:$0xff]  ;;  %p1263_p10 = scmp.lt.s32.totalorder %s1261_s9, %s1257_s28 }
  0x2f   : > { %v1057_v20 = vld [vmem:[%s1462_s19 + $0x18] sm:$0xff]  ;;  %v1491_v24 = vld [vmem:[%s1600_s2] ss:$0 sm:$0xff]  ;;  %p1259_p4 = pnand %p1258_p1, %p1435_p3 }
  0x30   : > { %v1061_v21 = vld [vmem:[%s1462_s19 + $0x38] sm:$0xff]  ;;  %p1264_p11 = por %p1263_p10, %p1262_p9 }
  0x31   : > { %522 = vmatpush.bf16.msra.mxu0 %v1075_v2  ;;  %1085 = vmatpush.bf16.msra.mxu1 %v1075_v2  ;;  %v1065_v22 = vld [vmem:[%s1462_s19 + $0x58] sm:$0xff]  ;;  %p1260_p8 = pneg %p1259_p4 }
  0x32   : > { %1086 = vmatpush.bf16.msra.mxu2 %v1075_v2  ;;  %1087 = vmatpush.bf16.msra.mxu3 %v1075_v2  ;;  %v1069_v23 = vld [vmem:[%s1462_s19 + $0x78] sm:$0xff] }
  0x33   : > { %p1265_p12 = pnand %p1264_p11, %p1260_p8 }
  0x35   : > { %523 = vmatpush.bf16.msra.mxu0 %v1074_v3  ;;  %1088 = vmatpush.bf16.msra.mxu1 %v1074_v3 }
  0x36   : > { %1089 = vmatpush.bf16.msra.mxu2 %v1074_v3  ;;  %1090 = vmatpush.bf16.msra.mxu3 %v1074_v3 }
  0x39   : > { %524 = vmatpush.bf16.msra.mxu0 %v1073_v4  ;;  %1091 = vmatpush.bf16.msra.mxu1 %v1073_v4 }
  0x3a   : > { %1092 = vmatpush.bf16.msra.mxu2 %v1073_v4  ;;  %1093 = vmatpush.bf16.msra.mxu3 %v1073_v4 }
  0x3d   : > { %525 = vmatpush.bf16.msra.mxu0 %v1072_v5  ;;  %1094 = vmatpush.bf16.msra.mxu1 %v1072_v5 }
  0x3e   : > { %1095 = vmatpush.bf16.msra.mxu2 %v1072_v5  ;;  %1096 = vmatpush.bf16.msra.mxu3 %v1072_v5 }
  0x41   : > { %526 = vmatpush.bf16.msra.mxu0 %v1071_v6  ;;  %1097 = vmatpush.bf16.msra.mxu1 %v1071_v6 }
  0x42   : > { %1098 = vmatpush.bf16.msra.mxu2 %v1071_v6  ;;  %1099 = vmatpush.bf16.msra.mxu3 %v1071_v6 }
  0x45   : > { %527 = vmatpush.bf16.msra.mxu0 %v1070_v7  ;;  %1100 = vmatpush.bf16.msra.mxu1 %v1070_v7 }
  0x46   : > { %1101 = vmatpush.bf16.msra.mxu2 %v1070_v7  ;;  %1102 = vmatpush.bf16.msra.mxu3 %v1070_v7 }
  0x48   : > { %528 = vmatmul.bf16.vlgmr.msra.gmra.mxu0 %v1054_v8  ;;  %548 = vmatmul.bf16.vlgmr.msra.gmra.mxu1 %v1058_v9 }
  0x49   : > { %568 = vmatmul.bf16.vlgmr.msra.gmra.mxu2 %v1062_v10  ;;  %588 = vmatmul.bf16.vlgmr.msra.gmra.mxu3 %v1066_v11 }
  0x58   : > { %533 = vmatmul.bf16.gmra.mxu0 %v1055_v12  ;;  %553 = vmatmul.bf16.gmra.mxu1 %v1059_v13 }
  0x59   : > { %573 = vmatmul.bf16.gmra.mxu2 %v1063_v14  ;;  %593 = vmatmul.bf16.gmra.mxu3 %v1067_v15 }
  0x68   : > { %538 = vmatmul.bf16.gmra.mxu0 %v1056_v16  ;;  %558 = vmatmul.bf16.gmra.mxu1 %v1060_v17 }
  0x69   : > { %578 = vmatmul.bf16.gmra.mxu2 %v1064_v18  ;;  %598 = vmatmul.bf16.gmra.mxu3 %v1068_v19 }
  0x78   : > { %543 = vmatmul.bf16.gmra.mxu0 %v1057_v20  ;;  %563 = vmatmul.bf16.gmra.mxu1 %v1061_v21 }
  0x79   : > { %583 = vmatmul.bf16.gmra.mxu2 %v1065_v22  ;;  %603 = vmatmul.bf16.gmra.mxu3 %v1069_v23 }
  0xc5   : > { %v529_v25 = vpop.f32.mrf.mxu0  ;;  %v549_v26 = vpop.f32.mrf.mxu1 }
  0xc6   : > { %v712_v27 = vadd.f32 %v1491_v24, %v529_v25  ;;  %v720_v28 = vadd.f32 %v1491_v24, %v549_v26 }
  0xc8   : > { %v744_v29 = vmax.f32 %v712_v27, 0.0  ;;  %v752_v30 = vmax.f32 %v720_v28, 0.0 }
  0xca   : > { %776 = vst [vmem:[%s1496_s27] sm:$0xff] %v744_v29 }
  0xcb   : > { %784 = vst [vmem:[%s1496_s27 + $0x40] sm:$0xff] %v752_v30 }
  0xcc   : > { %v569_v31 = vpop.f32.mrf.mxu2  ;;  %v589_v32 = vpop.f32.mrf.mxu3 }
  0xcd   : > { %v728_v33 = vadd.f32 %v1491_v24, %v569_v31  ;;  %v736_v34 = vadd.f32 %v1491_v24, %v589_v32  ;;  %v531_v35 = vpop.f32.mrf.mxu0  ;;  %v551_v36 = vpop.f32.mrf.mxu1 }
  0xce   : > { %v713_v37 = vadd.f32 %v1491_v24, %v531_v35  ;;  %v721_v38 = vadd.f32 %v1491_v24, %v551_v36 }
  0xcf   : > { %v760_v39 = vmax.f32 %v728_v33, 0.0  ;;  %v768_v40 = vmax.f32 %v736_v34, 0.0 }
  0xd0   : > { %v745_v41 = vmax.f32 %v713_v37, 0.0  ;;  %v753_v42 = vmax.f32 %v721_v38, 0.0 }
  0xd1   : > { %792 = vst [vmem:[%s1496_s27 + $0x80] sm:$0xff] %v760_v39 }
  0xd2   : > { %800 = vst [vmem:[%s1496_s27 + $0xc0] sm:$0xff] %v768_v40 }
  0xd3   : > { %777 = vst [vmem:[%s1496_s27 + $0x8] sm:$0xff] %v745_v41 }
  0xd4   : > { %785 = vst [vmem:[%s1496_s27 + $0x48] sm:$0xff] %v753_v42  ;;  %v571_v43 = vpop.f32.mrf.mxu2  ;;  %v591_v44 = vpop.f32.mrf.mxu3 }
  0xd5   : > { %v729_v45 = vadd.f32 %v1491_v24, %v571_v43  ;;  %v737_v46 = vadd.f32 %v1491_v24, %v591_v44  ;;  %v534_v47 = vpop.f32.mrf.mxu0  ;;  %v554_v48 = vpop.f32.mrf.mxu1 }
  0xd6   : > { %v714_v49 = vadd.f32 %v1491_v24, %v534_v47  ;;  %v722_v50 = vadd.f32 %v1491_v24, %v554_v48 }
  0xd7   : > { %v761_v51 = vmax.f32 %v729_v45, 0.0  ;;  %v769_v52 = vmax.f32 %v737_v46, 0.0 }
  0xd8   : > { %v746_v53 = vmax.f32 %v714_v49, 0.0  ;;  %v754_v54 = vmax.f32 %v722_v50, 0.0 }
  0xd9   : > { %793 = vst [vmem:[%s1496_s27 + $0x88] sm:$0xff] %v761_v51 }
  0xda   : > { %801 = vst [vmem:[%s1496_s27 + $0xc8] sm:$0xff] %v769_v52 }
  0xdb   : > { %778 = vst [vmem:[%s1496_s27 + $0x10] sm:$0xff] %v746_v53 }
  0xdc   : > { %786 = vst [vmem:[%s1496_s27 + $0x50] sm:$0xff] %v754_v54  ;;  %v574_v55 = vpop.f32.mrf.mxu2  ;;  %v594_v56 = vpop.f32.mrf.mxu3 }
  0xdd   : > { %v730_v57 = vadd.f32 %v1491_v24, %v574_v55  ;;  %v738_v58 = vadd.f32 %v1491_v24, %v594_v56  ;;  %v536_v59 = vpop.f32.mrf.mxu0  ;;  %v556_v60 = vpop.f32.mrf.mxu1 }
  0xde   : > { %v715_v61 = vadd.f32 %v1491_v24, %v536_v59  ;;  %v723_v62 = vadd.f32 %v1491_v24, %v556_v60 }
  0xdf   : > { %v762_v63 = vmax.f32 %v730_v57, 0.0  ;;  %v770_v0 = vmax.f32 %v738_v58, 0.0 }
  0xe0   : > { %v747_v1 = vmax.f32 %v715_v61, 0.0  ;;  %v755_v2 = vmax.f32 %v723_v62, 0.0 }
  0xe1   : > { %794 = vst [vmem:[%s1496_s27 + $0x90] sm:$0xff] %v762_v63 }
  0xe2   : > { %802 = vst [vmem:[%s1496_s27 + $0xd0] sm:$0xff] %v770_v0 }
  0xe3   : > { %779 = vst [vmem:[%s1496_s27 + $0x18] sm:$0xff] %v747_v1 }
  0xe4   : > { %787 = vst [vmem:[%s1496_s27 + $0x58] sm:$0xff] %v755_v2  ;;  %v576_v3 = vpop.f32.mrf.mxu2  ;;  %v596_v4 = vpop.f32.mrf.mxu3 }
  0xe5   : > { %v731_v5 = vadd.f32 %v1491_v24, %v576_v3  ;;  %v739_v6 = vadd.f32 %v1491_v24, %v596_v4  ;;  %v539_v7 = vpop.f32.mrf.mxu0  ;;  %v559_v8 = vpop.f32.mrf.mxu1 }
  0xe6   : > { %v716_v9 = vadd.f32 %v1491_v24, %v539_v7  ;;  %v724_v10 = vadd.f32 %v1491_v24, %v559_v8 }
  0xe7   : > { %v763_v11 = vmax.f32 %v731_v5, 0.0  ;;  %v771_v12 = vmax.f32 %v739_v6, 0.0 }
  0xe8   : > { %v748_v13 = vmax.f32 %v716_v9, 0.0  ;;  %v756_v14 = vmax.f32 %v724_v10, 0.0 }
  0xe9   : > { %795 = vst [vmem:[%s1496_s27 + $0x98] sm:$0xff] %v763_v11 }
  0xea   : > { %803 = vst [vmem:[%s1496_s27 + $0xd8] sm:$0xff] %v771_v12 }
  0xeb   : > { %780 = vst [vmem:[%s1496_s27 + $0x20] sm:$0xff] %v748_v13 }
  0xec   : > { %788 = vst [vmem:[%s1496_s27 + $0x60] sm:$0xff] %v756_v14  ;;  %v579_v15 = vpop.f32.mrf.mxu2  ;;  %v599_v16 = vpop.f32.mrf.mxu3 }
  0xed   : > { %v732_v17 = vadd.f32 %v1491_v24, %v579_v15  ;;  %v740_v18 = vadd.f32 %v1491_v24, %v599_v16  ;;  %v541_v19 = vpop.f32.mrf.mxu0  ;;  %v561_v20 = vpop.f32.mrf.mxu1 }
  0xee   : > { %v717_v21 = vadd.f32 %v1491_v24, %v541_v19  ;;  %v725_v22 = vadd.f32 %v1491_v24, %v561_v20 }
  0xef   : > { %v764_v23 = vmax.f32 %v732_v17, 0.0  ;;  %v772_v25 = vmax.f32 %v740_v18, 0.0 }
  0xf0   : > { %v749_v26 = vmax.f32 %v717_v21, 0.0  ;;  %v757_v27 = vmax.f32 %v725_v22, 0.0 }
  0xf1   : > { %796 = vst [vmem:[%s1496_s27 + $0xa0] sm:$0xff] %v764_v23 }
  0xf2   : > { %804 = vst [vmem:[%s1496_s27 + $0xe0] sm:$0xff] %v772_v25 }
  0xf3   : > { %781 = vst [vmem:[%s1496_s27 + $0x28] sm:$0xff] %v749_v26 }
  0xf4   : > { %789 = vst [vmem:[%s1496_s27 + $0x68] sm:$0xff] %v757_v27  ;;  %v581_v28 = vpop.f32.mrf.mxu2  ;;  %v601_v29 = vpop.f32.mrf.mxu3 }
  0xf5   : > { %v733_v30 = vadd.f32 %v1491_v24, %v581_v28  ;;  %v741_v31 = vadd.f32 %v1491_v24, %v601_v29  ;;  %v544_v32 = vpop.f32.mrf.mxu0  ;;  %v564_v33 = vpop.f32.mrf.mxu1 }
  0xf6   : > { %v718_v34 = vadd.f32 %v1491_v24, %v544_v32  ;;  %v726_v35 = vadd.f32 %v1491_v24, %v564_v33 }
  0xf7   : > { %v765_v36 = vmax.f32 %v733_v30, 0.0  ;;  %v773_v37 = vmax.f32 %v741_v31, 0.0 }
  0xf8   : > { %v750_v38 = vmax.f32 %v718_v34, 0.0  ;;  %v758_v39 = vmax.f32 %v726_v35, 0.0 }
  0xf9   : > { %797 = vst [vmem:[%s1496_s27 + $0xa8] sm:$0xff] %v765_v36 }
  0xfa   : > { %805 = vst [vmem:[%s1496_s27 + $0xe8] sm:$0xff] %v773_v37 }
  0xfb   : > { %782 = vst [vmem:[%s1496_s27 + $0x30] sm:$0xff] %v750_v38 }
  0xfc   : > { %790 = vst [vmem:[%s1496_s27 + $0x70] sm:$0xff] %v758_v39  ;;  %v584_v40 = vpop.f32.mrf.mxu2  ;;  %v604_v41 = vpop.f32.mrf.mxu3 }
  0xfd   : > { %v734_v42 = vadd.f32 %v1491_v24, %v584_v40  ;;  %v742_v43 = vadd.f32 %v1491_v24, %v604_v41  ;;  %v546_v44 = vpop.f32.mrf.mxu0  ;;  %v566_v45 = vpop.f32.mrf.mxu1 }
  0xfe   : > { %v719_v46 = vadd.f32 %v1491_v24, %v546_v44  ;;  %v727_v47 = vadd.f32 %v1491_v24, %v566_v45 }
  0xff   : > { %v766_v48 = vmax.f32 %v734_v42, 0.0  ;;  %v774_v49 = vmax.f32 %v742_v43, 0.0 }
 0x100   : > { %v751_v50 = vmax.f32 %v719_v46, 0.0  ;;  %v759_v51 = vmax.f32 %v727_v47, 0.0 }
 0x101   : > { %798 = vst [vmem:[%s1496_s27 + $0xb0] sm:$0xff] %v766_v48 }
 0x102   : > { %806 = vst [vmem:[%s1496_s27 + $0xf0] sm:$0xff] %v774_v49 }
 0x103   : > { %783 = vst [vmem:[%s1496_s27 + $0x38] sm:$0xff] %v751_v50 }
 0x104   : > { %791 = vst [vmem:[%s1496_s27 + $0x78] sm:$0xff] %v759_v51  ;;  %v586_v52 = vpop.f32.mrf.mxu2  ;;  %v606_v53 = vpop.f32.mrf.mxu3 }
 0x105   : > { %v735_v54 = vadd.f32 %v1491_v24, %v586_v52  ;;  %v743_v55 = vadd.f32 %v1491_v24, %v606_v53 }
 0x107   : > { %v767_v56 = vmax.f32 %v735_v54, 0.0  ;;  %v775_v57 = vmax.f32 %v743_v55, 0.0 }
 0x109   : > { %799 = vst [vmem:[%s1496_s27 + $0xb8] sm:$0xff] %v767_v56 }
 0x10a   : > { %807 = vst [vmem:[%s1496_s27 + $0xf8] sm:$0xff] %v775_v57 }
 0x10b   : > { %1268 = shalt.err (!%p1265_p12)
}
 0x10c   : > { %s1332_s6 = smov 128   ;;  %s1333_s1 = smov 8  }
 0x10d   : > { %1109 = dma.vmem_to_hbm [thread:$0]  (%p1435_p3), %s823_s24, 4096, %s825_s15, %s809_s25, %s1332_s6, %s1332_s6, %s1333_s1  }
 0x10e PF: > { %p1126_p13 = scmp.ge.s32.totalorder %s1327_s17, 2  ;;  %s839_s20 = sand.u32 1, %s1307_s12  }
 0x10f   : > { %s840_s22 = scalar_lea.sflag [#allocation5], %s839_s20 }
 0x110   : > { %p1120_p0 = pnand %p1126_p13, %p1403_p6 }
 0x112   : > { %p1121_p5 = pneg %p1120_p0 }
 0x114   : > { %1302 = dma.done.wait (%p1121_p5), %s840_s22, 4096  }
 0x115   : > { %1304 = vsyncadd (%p1121_p5), %s840_s22, 4294963200  ;;  %s20_s17 = sadd.s32 1, %s1327_s17   ;;  %s1613_s12 = smov %s1311_s13 }
 0x116   : > { %p17_p7 = scmp.ge.s32.totalorder %s20_s17, 10   ;;  %s1614_s13 = smov %s1315_s14 }
 0x117   : > { %s1615_s14 = smov %s1444_s18  ;;  %s1616_s15 = smov %s1323_s16 }
 0x118   : > { %s1617_s16 = smov %s1619_s5  ;;  %19 = sbr.rel (!%p17_p7) target bundleno = 9 (0x9), region = 93 }
 0x11d   :  { %846 = vsyncpa [#allocation4], 1 }
 0x11e   :  { %848 = vsyncpa [#allocation4 + $0x1], 1 }
 0x11f   :  { %849 = vsyncpa [#allocation7], 1 }
 0x120   :  { %850 = vsyncpa [#allocation5], 1 }
 0x121   :  { %852 = vsyncpa [#allocation5 + $0x1], 1 }

</bundles_post_ra>
